<compile_context>
chip_gen: v7x
topology: tpu7x:2x2x1
jax: 0.10.0
libtpu: 0.0.40
codegen_flags: <defaults>
</compile_context>

<pallas_src>
import functools
import math

import jax
import jax.numpy as jnp
from jax.experimental import pallas as pl
from jax.experimental.pallas import tpu as pltpu


def _round_up(x, m):
    return ((x + m - 1) // m) * m


def _embed_z_kernel(zi_ref, w_ref, out_ref, *, sub_rows):
    # zi_ref : VMEM (TN, 1)              int32, already shifted (z - 1); the
    #                                    ragged tail (if any) holds garbage ints
    # w_ref  : VMEM (n_terms, K_pad, E)  bf16 table components, rows >= max_z are 0
    # out_ref: VMEM (TN, E)
    tn = out_ref.shape[0]
    n_terms, k_pad, emb = w_ref.shape
    n_sub = tn // sub_rows

    def body(s, carry):
        start = pl.multiple_of(s * sub_rows, sub_rows)
        zi = zi_ref[pl.ds(start, sub_rows), :]                            # (sub, 1)
        cols = jax.lax.broadcasted_iota(jnp.int32, (sub_rows, k_pad), 1)  # (sub, K)
        one_hot = (cols == zi).astype(jnp.bfloat16)                       # exact 0/1

        # 1 (bf16 table) or 3 (exact f32 split) DEFAULT-precision MXU passes,
        # accumulated in f32.
        acc = jax.lax.dot_general(
            one_hot, w_ref[0],
            dimension_numbers=(((1,), (0,)), ((), ())),
            preferred_element_type=jnp.float32,
        )
        for t in range(1, n_terms):
            acc = acc + jax.lax.dot_general(
                one_hot, w_ref[t],
                dimension_numbers=(((1,), (0,)), ((), ())),
                preferred_element_type=jnp.float32,
            )
        out_ref[pl.ds(start, sub_rows), :] = acc.astype(out_ref.dtype)
        return carry

    jax.lax.fori_loop(0, n_sub, body, 0, unroll=True)


def embed_z(z, weight, *, block_rows=4096, sub_rows=512, min_pallas_rows=1024):
    """Pallas equivalent of EmbedZ.forward: weight[z - 1].

    Args:
      z:      (N,) int atomic numbers in [1, max_z].
      weight: (max_z, emb_size) embedding table (nn.Embedding weight), f32 or bf16.
      block_rows: rows per grid step (DMA block). Sweep 2048-8192 per chip.
      sub_rows:   rows per in-kernel compute sub-tile (multiple of 8).
      min_pallas_rows: below this N, use a plain XLA gather instead.

    Returns:
      (N, emb_size) embedding vectors, same dtype as `weight`.
    """
    max_z, emb_size = weight.shape
    n = z.shape[0]
    zi = z.astype(jnp.int32) - 1

    # Small-N fast path: pallas_call fixed cost dominates; plain gather wins.
    if n < min_pallas_rows:
        return jnp.take(weight, zi, axis=0)

    k_pad = _round_up(max_z, 128)

    # Table components. For f32 weights: exact one-sided 3-term bf16 split
    # (w1 = bf16(w), w2 = bf16(w - w1), w3 = bf16(w - w1 - w2); w1+w2+w3 == w
    # exactly for normal f32 values). For bf16 weights: single term.
    if weight.dtype == jnp.bfloat16:
        terms = [weight]
    else:
        w32 = weight.astype(jnp.float32)
        w1 = w32.astype(jnp.bfloat16)
        r1 = w32 - w1.astype(jnp.float32)
        w2 = r1.astype(jnp.bfloat16)
        r2 = r1 - w2.astype(jnp.float32)
        w3 = r2.astype(jnp.bfloat16)
        terms = [w1, w2, w3]
    n_terms = len(terms)
    w_stack = jnp.zeros((n_terms, k_pad, emb_size), jnp.bfloat16)
    w_stack = w_stack.at[:, :max_z, :].set(jnp.stack(terms))

    # Tile sizing: sub-tile is a multiple of 8 sublanes; the DMA block TN is a
    # multiple of the sub-tile. Keep at least ~2 blocks so "parallel" can shard
    # across both TensorCores on v7x.
    sub = max(8, _round_up(min(sub_rows, block_rows, n), 8))
    tn = _round_up(min(block_rows, n), sub)
    tn = max(sub, min(tn, _round_up(pl.cdiv(n, 2), sub)))

    zi2 = zi.reshape(n, 1)

    kernel = functools.partial(_embed_z_kernel, sub_rows=sub)

    out = pl.pallas_call(
        kernel,
        out_shape=jax.ShapeDtypeStruct((n, emb_size), weight.dtype),
        grid_spec=pltpu.PrefetchScalarGridSpec(
            num_scalar_prefetch=0,
            grid=(pl.cdiv(n, tn),),
            in_specs=[
                pl.BlockSpec((tn, 1), lambda i: (i, 0)),                  # indices
                pl.BlockSpec((n_terms, k_pad, emb_size),                  # table
                             lambda i: (0, 0, 0)),                        #  resident
            ],
            out_specs=pl.BlockSpec((tn, emb_size), lambda i: (i, 0)),
        ),
        compiler_params=pltpu.CompilerParams(
            dimension_semantics=("parallel",),   # shards blocks across TCs on v7x
        ),
    )(zi2, w_stack)
    return out


if __name__ == "__main__":
    key = jax.random.PRNGKey(0)
    k_w, k_z = jax.random.split(key)

    N = 300          # small test size; exercises 3 grid blocks + ragged tail
    max_z = 94       # default maximum atomic number in EmbedZ
    emb_size = 128   # embedding size (lane-dense output)

    # nn.Embedding weight with EmbedZ.reset_parameters init: U(-sqrt(3), sqrt(3)).
    lim = math.sqrt(3.0)
    weight = jax.random.uniform(k_w, (max_z, emb_size), jnp.float32, -lim, lim)
    z = jax.random.randint(k_z, (N,), 1, max_z + 1, dtype=jnp.int32)  # z in [1, max_z]

    # Small block/sub-tile sizes so the small test exercises the grid, the
    # in-kernel sub-tile loop and the ragged last block (300 = 128 + 128 + 44).
    out = embed_z(z, weight, block_rows=128, sub_rows=64, min_pallas_rows=0)
    out = jax.block_until_ready(out)

    ref = weight[z - 1]
    assert out.shape == (N, emb_size), out.shape
    assert out.dtype == weight.dtype, out.dtype
    # Exact 3-term bf16 split + f32 accumulation: tight tolerance (a wrong-row
    # selection or a lossy matmul would be orders of magnitude off).
    assert bool(jnp.allclose(out, ref, rtol=1e-6, atol=1e-6)), "f32 path mismatch"

    # bf16-table single-pass path.
    w_bf16 = weight.astype(jnp.bfloat16)
    out_bf16 = embed_z(z, w_bf16, block_rows=128, sub_rows=64, min_pallas_rows=0)
    out_bf16 = jax.block_until_ready(out_bf16)
    assert out_bf16.dtype == jnp.bfloat16
    assert bool(jnp.array_equal(out_bf16.astype(jnp.float32),
                                w_bf16[z - 1].astype(jnp.float32))), "bf16 path mismatch"

    # Small-N fast path (plain XLA gather).
    out_small = embed_z(z[:16], weight)
    assert bool(jnp.allclose(out_small, weight[z[:16] - 1])), "small-N path mismatch"

    print("KERNEL_OK")
</pallas_src>

<mosaic_0001>
module attributes {stable_mosaic.version = 11 : i64} {
  func.func @_embed_z_kernel(%arg0: i32, %arg1: memref<128x1xi32, #tpu.memory_space<vmem>>, %arg2: memref<3x128x128xbf16, #tpu.memory_space<vmem>>, %arg3: memref<128x128xf32, #tpu.memory_space<vmem>>) attributes {dimension_semantics = [#tpu.dimension_semantics<parallel>], iteration_bounds = array<i64: 3>, scalar_prefetch = 0 : i64, scratch_operands = 0 : i64, tpu.core_type = #tpu.core_type<tc>, window_params = [{transform_indices = @transform_0, window_bounds = array<i64: 128, 1>}, {pipeline_mode = #tpu.pipeline_mode<synchronous>, transform_indices = @transform_1, window_bounds = array<i64: 3, 128, 128>}, {transform_indices = @transform_2, window_bounds = array<i64: 128, 128>}]} {
    %c0_i32 = arith.constant 0 : i32
    %c64_i32 = arith.constant 64 : i32
    %0 = arith.muli %c0_i32, %c64_i32 : i32
    %1 = tpu.assume_multiple %0, 64 : i32
    %2 = arith.index_cast %1 : i32 to index
    %c0 = arith.constant 0 : index
    %3 = vector.load %arg1[%2, %c0] : memref<128x1xi32, #tpu.memory_space<vmem>>, vector<64x1xi32>
    %4 = tpu.iota {dimensions = array<i32: 1>} : vector<64x128xi32>
    %5 = vector.broadcast %3 : vector<64x1xi32> to vector<64x128xi32>
    %6 = arith.cmpi eq, %4, %5 : vector<64x128xi32>
    %7 = arith.extui %6 : vector<64x128xi1> to vector<64x128xi32>
    %8 = arith.sitofp %7 : vector<64x128xi32> to vector<64x128xf32>
    %9 = arith.truncf %8 : vector<64x128xf32> to vector<64x128xbf16>
    %c0_0 = arith.constant 0 : index
    %c0_1 = arith.constant 0 : index
    %c0_2 = arith.constant 0 : index
    %10 = vector.load %arg2[%c0_0, %c0_1, %c0_2] : memref<3x128x128xbf16, #tpu.memory_space<vmem>>, vector<1x128x128xbf16>
    %11 = vector.shape_cast %10 : vector<1x128x128xbf16> to vector<128x128xbf16>
    %cst = arith.constant dense<0.000000e+00> : vector<64x128xf32>
    %12 = tpu.matmul %9, %11, %cst {dimension_numbers = #tpu.dot_dimension_numbers<[1], [0], [0], [1], [0, 0, 1, 1], [], []>} : vector<64x128xbf16>, vector<128x128xbf16>, vector<64x128xf32> -> vector<64x128xf32>
    %c1 = arith.constant 1 : index
    %c0_3 = arith.constant 0 : index
    %c0_4 = arith.constant 0 : index
    %13 = vector.load %arg2[%c1, %c0_3, %c0_4] : memref<3x128x128xbf16, #tpu.memory_space<vmem>>, vector<1x128x128xbf16>
    %14 = vector.shape_cast %13 : vector<1x128x128xbf16> to vector<128x128xbf16>
    %cst_5 = arith.constant dense<0.000000e+00> : vector<64x128xf32>
    %15 = tpu.matmul %9, %14, %cst_5 {dimension_numbers = #tpu.dot_dimension_numbers<[1], [0], [0], [1], [0, 0, 1, 1], [], []>} : vector<64x128xbf16>, vector<128x128xbf16>, vector<64x128xf32> -> vector<64x128xf32>
    %16 = arith.addf %12, %15 : vector<64x128xf32>
    %c2 = arith.constant 2 : index
    %c0_6 = arith.constant 0 : index
    %c0_7 = arith.constant 0 : index
    %17 = vector.load %arg2[%c2, %c0_6, %c0_7] : memref<3x128x128xbf16, #tpu.memory_space<vmem>>, vector<1x128x128xbf16>
    %18 = vector.shape_cast %17 : vector<1x128x128xbf16> to vector<128x128xbf16>
    %cst_8 = arith.constant dense<0.000000e+00> : vector<64x128xf32>
    %19 = tpu.matmul %9, %18, %cst_8 {dimension_numbers = #tpu.dot_dimension_numbers<[1], [0], [0], [1], [0, 0, 1, 1], [], []>} : vector<64x128xbf16>, vector<128x128xbf16>, vector<64x128xf32> -> vector<64x128xf32>
    %20 = arith.addf %16, %19 : vector<64x128xf32>
    %21 = arith.index_cast %1 : i32 to index
    %c0_9 = arith.constant 0 : index
    %22 = vector.load %arg3[%21, %c0_9] : memref<128x128xf32, #tpu.memory_space<vmem>>, vector<64x128xf32>
    tpu.vector_store %arg3[%21, %c0_9], %20 {strides = array<i32>} : memref<128x128xf32, #tpu.memory_space<vmem>>, vector<64x128xf32>,
    %c1_i32 = arith.constant 1 : i32
    %c64_i32_10 = arith.constant 64 : i32
    %23 = arith.muli %c1_i32, %c64_i32_10 : i32
    %24 = tpu.assume_multiple %23, 64 : i32
    %25 = arith.index_cast %24 : i32 to index
    %c0_11 = arith.constant 0 : index
    %26 = vector.load %arg1[%25, %c0_11] : memref<128x1xi32, #tpu.memory_space<vmem>>, vector<64x1xi32>
    %27 = tpu.iota {dimensions = array<i32: 1>} : vector<64x128xi32>
    %28 = vector.broadcast %26 : vector<64x1xi32> to vector<64x128xi32>
    %29 = arith.cmpi eq, %27, %28 : vector<64x128xi32>
    %30 = arith.extui %29 : vector<64x128xi1> to vector<64x128xi32>
    %31 = arith.sitofp %30 : vector<64x128xi32> to vector<64x128xf32>
    %32 = arith.truncf %31 : vector<64x128xf32> to vector<64x128xbf16>
    %c0_12 = arith.constant 0 : index
    %c0_13 = arith.constant 0 : index
    %c0_14 = arith.constant 0 : index
    %33 = vector.load %arg2[%c0_12, %c0_13, %c0_14] : memref<3x128x128xbf16, #tpu.memory_space<vmem>>, vector<1x128x128xbf16>
    %34 = vector.shape_cast %33 : vector<1x128x128xbf16> to vector<128x128xbf16>
    %cst_15 = arith.constant dense<0.000000e+00> : vector<64x128xf32>
    %35 = tpu.matmul %32, %34, %cst_15 {dimension_numbers = #tpu.dot_dimension_numbers<[1], [0], [0], [1], [0, 0, 1, 1], [], []>} : vector<64x128xbf16>, vector<128x128xbf16>, vector<64x128xf32> -> vector<64x128xf32>
    %c1_16 = arith.constant 1 : index
    %c0_17 = arith.constant 0 : index
    %c0_18 = arith.constant 0 : index
    %36 = vector.load %arg2[%c1_16, %c0_17, %c0_18] : memref<3x128x128xbf16, #tpu.memory_space<vmem>>, vector<1x128x128xbf16>
    %37 = vector.shape_cast %36 : vector<1x128x128xbf16> to vector<128x128xbf16>
    %cst_19 = arith.constant dense<0.000000e+00> : vector<64x128xf32>
    %38 = tpu.matmul %32, %37, %cst_19 {dimension_numbers = #tpu.dot_dimension_numbers<[1], [0], [0], [1], [0, 0, 1, 1], [], []>} : vector<64x128xbf16>, vector<128x128xbf16>, vector<64x128xf32> -> vector<64x128xf32>
    %39 = arith.addf %35, %38 : vector<64x128xf32>
    %c2_20 = arith.constant 2 : index
    %c0_21 = arith.constant 0 : index
    %c0_22 = arith.constant 0 : index
    %40 = vector.load %arg2[%c2_20, %c0_21, %c0_22] : memref<3x128x128xbf16, #tpu.memory_space<vmem>>, vector<1x128x128xbf16>
    %41 = vector.shape_cast %40 : vector<1x128x128xbf16> to vector<128x128xbf16>
    %cst_23 = arith.constant dense<0.000000e+00> : vector<64x128xf32>
    %42 = tpu.matmul %32, %41, %cst_23 {dimension_numbers = #tpu.dot_dimension_numbers<[1], [0], [0], [1], [0, 0, 1, 1], [], []>} : vector<64x128xbf16>, vector<128x128xbf16>, vector<64x128xf32> -> vector<64x128xf32>
    %43 = arith.addf %39, %42 : vector<64x128xf32>
    %44 = arith.index_cast %24 : i32 to index
    %c0_24 = arith.constant 0 : index
    %45 = vector.load %arg3[%44, %c0_24] : memref<128x128xf32, #tpu.memory_space<vmem>>, vector<64x128xf32>
    tpu.vector_store %arg3[%44, %c0_24], %43 {strides = array<i32>} : memref<128x128xf32, #tpu.memory_space<vmem>>, vector<64x128xf32>,
    %c2_i32 = arith.constant 2 : i32
    return
  }
  func.func @transform_0(%arg0: i32) -> (i32, i32) {
    %c0_i32 = arith.constant 0 : i32
    %c0_i32_0 = arith.constant 0 : i32
    return %arg0, %c0_i32 : i32, i32
  }
  func.func @transform_1(%arg0: i32) -> (i32, i32, i32) {
    %c0_i32 = arith.constant 0 : i32
    %c0_i32_0 = arith.constant 0 : i32
    %c0_i32_1 = arith.constant 0 : i32
    %c0_i32_2 = arith.constant 0 : i32
    return %c0_i32, %c0_i32_0, %c0_i32_1 : i32, i32, i32
  }
  func.func @transform_2(%arg0: i32) -> (i32, i32) {
    %c0_i32 = arith.constant 0 : i32
    %c0_i32_0 = arith.constant 0 : i32
    return %arg0, %c0_i32 : i32, i32
  }
}

</mosaic_0001>

<bundles_post_ra>
// kernel: tpu_custom_call.1
= control target key start
LH: loop header
LB: loop body
LE: loop exit
PB: predicated region body
PF: predicated region fallthrough
CT: control target
= control target key end

     0   :  { %7 = vsyncpa [#allocation3], 0  ;;  %s2241_s0 = inlined_call_operand.vmem [shape: s32[300,1], index: 0, kind: input, shape index: {}]   ;;  %s2242_s1 = inlined_call_operand.vmem [shape: bf16[3,128,128], index: 1, kind: input, shape index: {}]   ;;  %s2243_s2 = inlined_call_operand.hbm [shape: f32[300,128], index: 2, kind: output, shape index: {}]  }
   0x1   :  { %9 = vsyncpa [#allocation3 + $0x1], 0  ;;  %s1817_s9 = smov 0   ;;  %s1819_s10 = smov 0  }
   0x2   :  { %s1821_s11 = smov 0   ;;  %s1823_s12 = smov 0  }
   0x3 LB: > { %s1838_s13 = sadd.s32 4294967295, %s1795_s12   ;;  %s1184_s14 = sadd.s32 4294967294, %s1795_s12   ;;  %s1795_s12 = sphi %s1823_s12, %s2265_s12   ;;  %s1791_s11 = sphi %s1821_s11, %s2264_s11   ;;  %s1787_s10 = sphi %s1819_s10, %s2263_s10   ;;  %s1783_s9 = sphi %s1817_s9, %s2262_s9  }
   0x4   : > { %s1842_s15 = sadd.s32 1, %s1795_s12   ;;  %s69_s16 = sadd.s32 1, %s1791_s11 }
   0x5   : > { %s66_s17 = ssub.s32 %s1795_s12, %s1842_s15  ;;  %p79_p0 = scmp.ne.s32.totalorder %s1791_s11, %s1787_s10 }
   0x6   : > { %p67_p1 = scmp.eq.s32.totalorder %s66_s17, 0  ;;  %p80_p2 = scmp.eq.s32.totalorder %s1838_s13, 2 }
   0x7   : > { %p85_p3 = scmp.ne.s32.totalorder %s1787_s10, %s1783_s9  ;;  %p86_p4 = scmp.eq.s32.totalorder %s1184_s14, 2 }
   0x8   : > { %s1853_s18 = scalar_select %p67_p1, %s1791_s11, %s69_s16  }
   0x9   : > { %p1855_p5 = por %p80_p2, %p79_p0  ;;  %p1859_p6 = por %p86_p4, %p85_p3 }
   0xa   : > { %p1187_p7 = scmp.ge.s32.totalorder %s1795_s12, 1  ;;  %p124_p8 = scmp.lt.s32.totalorder %s1795_s12, 4 }
   0xc   : > { %p125_p9 = pnand %p1187_p7, %p124_p8 }
   0xd   : > { %s1866_s21 = sshll.u32 (!%p125_p9), %s1838_s13, 4  ;;  %v1797_v0 = vmov (!%p125_p9), 0   ;;  %v1685_v1 = vld [vmem:[%s2242_s1 + $0x40] sm:$0xff] (!%p125_p9)   ;;  %v1686_v2 = vld [vmem:[%s2242_s1 + $0x48] sm:$0xff] (!%p125_p9)   ;;  %v1688_v5 = vld [vmem:[%s2242_s1 + $0x50] sm:$0xff] (!%p125_p9)   ;;  %v178_v35 = vlaneseq (!%p125_p9)  ;;  %s147_s5 = sand.u32 (!%p125_p9), 1, %s1787_s10  }
   0xe   : > { %128 = sbr.rel (%p125_p9) target bundleno = 486 (0x1e6), region = 28  ;;  %1684 = vset.pattern.permute.xlu1 (!%p125_p9), %v1797_v0  ;;  %1683 = vset.pattern.permute.xlu0 (!%p125_p9), %v1797_v0  ;;  %p155_p10 = scmp.lt.s32.totalorder (!%p125_p9), %s1866_s21, 37  ;;  %v1687_v3 = vld [vmem:[%s2242_s1 + $0x40] sm:$0xff] (!%p125_p9)   ;;  %v1689_v4 = vld [vmem:[%s2242_s1 + $0x48] sm:$0xff] (!%p125_p9)   ;;  %v1690_v10 = vld [vmem:[%s2242_s1 + $0x58] sm:$0xff] (!%p125_p9)  }
   0xf   : > { %1465 = vmatprep.subr.bf16.mxu0 (!%p125_p9), %v1685_v1  ;;  %1537 = vmatprep.subr.bf16.mxu1 (!%p125_p9), %v1687_v3  ;;  %v1691_v13 = vld [vmem:[%s2242_s1 + $0x50] sm:$0xff] (!%p125_p9)   ;;  %v1692_v14 = vld [vmem:[%s2242_s1 + $0x60] sm:$0xff] (!%p125_p9)   ;;  %v1693_v15 = vld [vmem:[%s2242_s1 + $0x58] sm:$0xff] (!%p125_p9)   ;;  %v1945_v38 = vand.u32 (!%p125_p9), 127, %v178_v35  ;;  %v1798_v43 = vmov (!%p125_p9), 1.0|1.0  }
  0x10   : > { %1466 = vmatpush3.bf16.msra.mxu0 (!%p125_p9), %v1685_v1  ;;  %1538 = vmatpush3.bf16.msra.mxu1 (!%p125_p9), %v1687_v3  ;;  %v1695_v18 = vld [vmem:[%s2242_s1 + $0x60] sm:$0xff] (!%p125_p9)   ;;  %v1694_v19 = vld [vmem:[%s2242_s1 + $0x68] sm:$0xff] (!%p125_p9)   ;;  %v1696_v23 = vld [vmem:[%s2242_s1 + $0x70] sm:$0xff] (!%p125_p9)   ;;  %s1188_s7 = sshll.u32 (!%p125_p9), %s147_s5, 7  ;;  %s2180_s14 = scalar_lea.sflag (!%p125_p9), [#allocation3], %s147_s5 }
  0x11   : > { %1467 = vmatprep.subr.bf16.mxu0 (!%p125_p9), %v1686_v2  ;;  %1539 = vmatprep.subr.bf16.mxu1 (!%p125_p9), %v1689_v4  ;;  %v1697_v22 = vld [vmem:[%s2242_s1 + $0x68] sm:$0xff] (!%p125_p9)   ;;  %v1699_v26 = vld [vmem:[%s2242_s1 + $0x70] sm:$0xff] (!%p125_p9)   ;;  %v1698_v27 = vld [vmem:[%s2242_s1 + $0x78] sm:$0xff] (!%p125_p9)   ;;  %s2160_s8 = scalar_lea.vmem (!%p125_p9), [#allocation2], %s1188_s7 }
  0x12   : > { %v1700_v30 = vld [vmem:[%s2242_s1] sm:$0xff] (!%p125_p9)   ;;  %v1701_v31 = vld [vmem:[%s2242_s1 + $0x78] sm:$0xff] (!%p125_p9)   ;;  %v1702_v46 = vld [vmem:[%s2242_s1 + $0x8] sm:$0xff] (!%p125_p9)  }
  0x13   : > { %v1703_v34 = vld [vmem:[%s2242_s1] sm:$0xff] (!%p125_p9)   ;;  %v1704_v50 = vld [vmem:[%s2242_s1 + $0x10] sm:$0xff] (!%p125_p9)   ;;  %v1705_v51 = vld [vmem:[%s2242_s1 + $0x8] sm:$0xff] (!%p125_p9)  }
  0x14   : > { %1468 = vmatpush3.bf16.msra.mxu0 (!%p125_p9), %v1686_v2  ;;  %1540 = vmatpush3.bf16.msra.mxu1 (!%p125_p9), %v1689_v4  ;;  %v1706_v55 = vld [vmem:[%s2242_s1 + $0x18] sm:$0xff] (!%p125_p9)   ;;  %v1707_v56 = vld [vmem:[%s2242_s1 + $0x10] sm:$0xff] (!%p125_p9)   ;;  %v1708_v60 = vld [vmem:[%s2242_s1 + $0x20] sm:$0xff] (!%p125_p9)  }
  0x15   : > { %s156_s26 = scalar_select %p155_p10, %s1866_s21, 37  ;;  %1469 = vmatprep.subr.bf16.mxu0 %v1688_v5  ;;  %1541 = vmatprep.subr.bf16.mxu1 %v1691_v13  ;;  %v1709_v61 = vld [vmem:[%s2242_s1 + $0x18] sm:$0xff]   ;;  %v1710_v1 = vld [vmem:[%s2242_s1 + $0x28] sm:$0xff]   ;;  %v1711_v3 = vld [vmem:[%s2242_s1 + $0x20] sm:$0xff]  }
  0x16   : > { %s1111_s16 = ssub.s32 (%p1855_p5), 38, %s1866_s21 }
  0x17   : > { %s1190_s29 = sshll.u32 %s156_s26, 3  ;;  %p1112_p11 = scmp.lt.s32.totalorder (%p1855_p5), %s1111_s16, 16 }
  0x18   : > { %s1885_s6 = scalar_lea.vmem %s2241_s0, %s1190_s29  ;;  %1470 = vmatpush3.bf16.msra.mxu0 %v1688_v5  ;;  %1542 = vmatpush3.bf16.msra.mxu1 %v1691_v13  ;;  %v1718_v13 = vld [vmem:[%s2242_s1 + $0x88] sm:$0xff]  }
  0x19   : > { %v1279_v6 = vld [vmem:[%s1885_s6 + $0x40] sm:$0xff]  ;;  %v1280_v8 = vld [vmem:[%s1885_s6 + $0x48] sm:$0xff]  ;;  %v173_v11 = vld [vmem:[%s1885_s6 + $0x18] sm:$0xff]  ;;  %1471 = vmatprep.subr.bf16.mxu0 %v1690_v10  ;;  %1543 = vmatprep.subr.bf16.mxu1 %v1693_v15 }
  0x1a   : > { %v170_v7 = vld [vmem:[%s1885_s6] sm:$0xff]  ;;  %647 = vperm.xlu1 %1684, %v1279_v6   ;;  %v171_v9 = vld [vmem:[%s1885_s6 + $0x8] sm:$0xff]  ;;  %v172_v12 = vld [vmem:[%s1885_s6 + $0x10] sm:$0xff] }
  0x1b   : > { %181 = vperm.xlu0 %1683, %v170_v7   ;;  %v1282_v16 = vld [vmem:[%s1885_s6 + $0x58] sm:$0xff]  ;;  %v1281_v17 = vld [vmem:[%s1885_s6 + $0x50] sm:$0xff]  ;;  %v175_v20 = vld [vmem:[%s1885_s6 + $0x28] sm:$0xff] }
  0x1c   : > { %1472 = vmatpush3.bf16.msra.mxu0 %v1690_v10  ;;  %1544 = vmatpush3.bf16.msra.mxu1 %v1693_v15  ;;  %v174_v21 = vld [vmem:[%s1885_s6 + $0x20] sm:$0xff]  ;;  %v1284_v24 = vld [vmem:[%s1885_s6 + $0x68] sm:$0xff]  ;;  %v177_v28 = vld [vmem:[%s1885_s6 + $0x38] sm:$0xff] }
  0x1d   : > { %1473 = vmatprep.subr.bf16.mxu0 %v1692_v14  ;;  %1545 = vmatprep.subr.bf16.mxu1 %v1695_v18  ;;  %v1283_v25 = vld [vmem:[%s1885_s6 + $0x60] sm:$0xff]  ;;  %v176_v29 = vld [vmem:[%s1885_s6 + $0x30] sm:$0xff]  ;;  %v1286_v32 = vld [vmem:[%s1885_s6 + $0x78] sm:$0xff] }
  0x1e   : > { %650 = vperm.xlu1 %1684, %v1280_v8   ;;  %v1285_v33 = vld [vmem:[%s1885_s6 + $0x70] sm:$0xff]  ;;  %v1713_v8 = vld [vmem:[%s2242_s1 + $0x28] sm:$0xff]  }
  0x1f   : > { %184 = vperm.xlu0 %1683, %v171_v9   ;;  %v1712_v6 = vld [vmem:[%s2242_s1 + $0x30] sm:$0xff]   ;;  %v1714_v9 = vld [vmem:[%s2242_s1 + $0x38] sm:$0xff]  }
  0x20   : > { %1474 = vmatpush3.bf16.msra.mxu0 %v1692_v14  ;;  %1546 = vmatpush3.bf16.msra.mxu1 %v1695_v18  ;;  %v1715_v10 = vld [vmem:[%s2242_s1 + $0x30] sm:$0xff]   ;;  %v1719_v14 = vld [vmem:[%s2242_s1 + $0x80] sm:$0xff]  }
  0x21   : > { %1475 = vmatprep.subr.bf16.mxu0 %v1694_v19  ;;  %1547 = vmatprep.subr.bf16.mxu1 %v1697_v22  ;;  %v1720_v15 = vld [vmem:[%s2242_s1 + $0x90] sm:$0xff]  }
  0x22   : > { %190 = vperm.xlu1 %1684, %v173_v11   ;;  %v1716_v11 = vld [vmem:[%s2242_s1 + $0x80] sm:$0xff]   ;;  %v1723_v18 = vld [vmem:[%s2242_s1 + $0x90] sm:$0xff]  }
  0x23   : > { %187 = vperm.xlu0 %1683, %v172_v12   ;;  %v1717_v12 = vld [vmem:[%s2242_s1 + $0x38] sm:$0xff]  }
  0x24   : > { %1476 = vmatpush3.bf16.msra.mxu0 %v1694_v19  ;;  %1548 = vmatpush3.bf16.msra.mxu1 %v1697_v22  ;;  %v1724_v19 = vld [vmem:[%s2242_s1 + $0xa0] sm:$0xff]  }
  0x25   : > { %1477 = vmatprep.subr.bf16.mxu0 %v1696_v23  ;;  %1549 = vmatprep.subr.bf16.mxu1 %v1699_v26  ;;  %v1727_v22 = vld [vmem:[%s2242_s1 + $0xa0] sm:$0xff]  }
  0x26   : > { %656 = vperm.xlu1 %1684, %v1282_v16   ;;  %v1721_v16 = vld [vmem:[%s2242_s1 + $0x88] sm:$0xff]  }
  0x27   : > { %653 = vperm.xlu0 %1683, %v1281_v17   ;;  %v1722_v17 = vld [vmem:[%s2242_s1 + $0x98] sm:$0xff]  }
  0x28   : > { %1478 = vmatpush3.bf16.msra.mxu0 %v1696_v23  ;;  %1550 = vmatpush3.bf16.msra.mxu1 %v1699_v26  ;;  %v1728_v23 = vld [vmem:[%s2242_s1 + $0xb0] sm:$0xff]  }
  0x29   : > { %1479 = vmatprep.subr.bf16.mxu0 %v1698_v27  ;;  %1551 = vmatprep.subr.bf16.mxu1 %v1701_v31  ;;  %v1731_v26 = vld [vmem:[%s2242_s1 + $0xb0] sm:$0xff]  }
  0x2a   : > { %196 = vperm.xlu1 %1684, %v175_v20   ;;  %v1725_v20 = vld [vmem:[%s2242_s1 + $0x98] sm:$0xff]  }
  0x2b   : > { %193 = vperm.xlu0 %1683, %v174_v21   ;;  %v1726_v21 = vld [vmem:[%s2242_s1 + $0xa8] sm:$0xff]  }
  0x2c   : > { %1480 = vmatpush3.bf16.msra.mxu0 %v1698_v27  ;;  %1552 = vmatpush3.bf16.msra.mxu1 %v1701_v31  ;;  %v1732_v27 = vld [vmem:[%s2242_s1 + $0xb8] sm:$0xff]  }
  0x2d   : > { %1489 = vmatprep.subr.bf16.mxu0 %v1700_v30  ;;  %1561 = vmatprep.subr.bf16.mxu1 %v1703_v34 }
  0x2e   : > { %662 = vperm.xlu1 %1684, %v1284_v24   ;;  %v1729_v24 = vld [vmem:[%s2242_s1 + $0xa8] sm:$0xff]  }
  0x2f   : > { %659 = vperm.xlu0 %1683, %v1283_v25   ;;  %v1730_v25 = vld [vmem:[%s2242_s1 + $0xb8] sm:$0xff]  }
  0x32   : > { %202 = vperm.xlu1 %1684, %v177_v28  }
  0x33   : > { %199 = vperm.xlu0 %1683, %v176_v29  }
  0x36   : > { %668 = vperm.xlu1 %1684, %v1286_v32  }
  0x37   : > { %665 = vperm.xlu0 %1683, %v1285_v33  }
  0x99   : > { %v648_v36 = vpop.permute.xlu1 %647 }
  0x9a   : > { %v182_v37 = vpop.permute.xlu0 %181  ;;  %vm670_vm0 = vcmp.eq.s32.totalorder %v1945_v38, %v648_v36 }
  0x9b   : > { %vm204_vm3 = vcmp.eq.s32.totalorder %v1945_v38, %v182_v37 }
  0x9d   : > { %v651_v39 = vpop.permute.xlu1 %650 }
  0x9e   : > { %v185_v40 = vpop.permute.xlu0 %184  ;;  %vm671_vm1 = vcmp.eq.s32.totalorder %v1945_v38, %v651_v39 }
  0x9f   : > { %vm205_vm2 = vcmp.eq.s32.totalorder %v1945_v38, %v185_v40  ;;  %vm1951_vm4 = vmpackc.low %vm671_vm1, %vm670_vm0 }
  0xa0   : > { %vm1955_vm5 = vmpackc.low %vm205_vm2, %vm204_vm3  ;;  %1553 = vmatprep.mubr.msk.bf16.mxu1 %vm1951_vm4, %v1798_v43 }
  0xa1   : > { %1481 = vmatprep.mubr.msk.bf16.mxu0 %vm1955_vm5, %v1798_v43  ;;  %v191_v44 = vpop.permute.xlu1 %190 }
  0xa2   : > { %v188_v45 = vpop.permute.xlu0 %187  ;;  %vm207_vm6 = vcmp.eq.s32.totalorder %v1945_v38, %v191_v44 }
  0xa3   : > { %vm206_vm7 = vcmp.eq.s32.totalorder %v1945_v38, %v188_v45 }
  0xa4   : > { %vm1970_vm8 = vmpackc.low %vm207_vm6, %vm206_vm7 }
  0xa5   : > { %1482 = vmatmul.mubr.msk.bf16.vlgmr.msra.gmra.mrb[0].mxu0 %vm1970_vm8, %v1798_v43  ;;  %v657_v48 = vpop.permute.xlu1 %656 }
  0xa6   : > { %1490 = vmatpush3.bf16.msra.mxu0 %v1700_v30  ;;  %v654_v49 = vpop.permute.xlu0 %653  ;;  %vm673_vm9 = vcmp.eq.s32.totalorder %v1945_v38, %v657_v48 }
  0xa7   : > { %vm672_vm10 = vcmp.eq.s32.totalorder %v1945_v38, %v654_v49  ;;  %1491 = vmatprep.subr.bf16.mxu0 %v1702_v46 }
  0xa8   : > { %vm1985_vm11 = vmpackc.low %vm673_vm9, %vm672_vm10 }
  0xa9   : > { %1554 = vmatmul.mubr.msk.bf16.vlgmr.msra.gmra.mrb[0].mxu1 %vm1985_vm11, %v1798_v43  ;;  %v197_v53 = vpop.permute.xlu1 %196 }
  0xaa   : > { %1492 = vmatpush3.bf16.msra.mxu0 %v1702_v46  ;;  %1562 = vmatpush3.bf16.msra.mxu1 %v1703_v34  ;;  %v194_v54 = vpop.permute.xlu0 %193  ;;  %vm209_vm12 = vcmp.eq.s32.totalorder %v1945_v38, %v197_v53 }
  0xab   : > { %vm208_vm13 = vcmp.eq.s32.totalorder %v1945_v38, %v194_v54  ;;  %1493 = vmatprep.subr.bf16.mxu0 %v1704_v50  ;;  %1563 = vmatprep.subr.bf16.mxu1 %v1705_v51 }
  0xac   : > { %vm2000_vm14 = vmpackc.low %vm209_vm12, %vm208_vm13 }
  0xad   : > { %1485 = vmatprep.mubr.msk.bf16.mxu0 %vm2000_vm14, %v1798_v43  ;;  %v663_v58 = vpop.permute.xlu1 %662 }
  0xae   : > { %1494 = vmatpush3.bf16.msra.mxu0 %v1704_v50  ;;  %1564 = vmatpush3.bf16.msra.mxu1 %v1705_v51  ;;  %v660_v59 = vpop.permute.xlu0 %659  ;;  %vm675_vm15 = vcmp.eq.s32.totalorder %v1945_v38, %v663_v58 }
  0xaf   : > { %vm674_vm0 = vcmp.eq.s32.totalorder %v1945_v38, %v660_v59  ;;  %1495 = vmatprep.subr.bf16.mxu0 %v1706_v55  ;;  %1565 = vmatprep.subr.bf16.mxu1 %v1707_v56 }
  0xb0   : > { %vm2015_vm1 = vmpackc.low %vm675_vm15, %vm674_vm0 }
  0xb1   : > { %1557 = vmatprep.mubr.msk.bf16.mxu1 %vm2015_vm1, %v1798_v43  ;;  %v203_v63 = vpop.permute.xlu1 %202 }
  0xb2   : > { %1496 = vmatpush3.bf16.msra.mxu0 %v1706_v55  ;;  %1566 = vmatpush3.bf16.msra.mxu1 %v1707_v56  ;;  %v200_v0 = vpop.permute.xlu0 %199  ;;  %vm211_vm2 = vcmp.eq.s32.totalorder %v1945_v38, %v203_v63 }
  0xb3   : > { %vm210_vm3 = vcmp.eq.s32.totalorder %v1945_v38, %v200_v0  ;;  %1497 = vmatprep.subr.bf16.mxu0 %v1708_v60  ;;  %1567 = vmatprep.subr.bf16.mxu1 %v1709_v61 }
  0xb4   : > { %vm2027_vm6 = vmpackc.low %vm211_vm2, %vm210_vm3 }
  0xb5   : > { %1486 = vmatmul.mubr.msk.bf16.gmra.mrb[4].mxu0 %vm2027_vm6, %v1798_v43  ;;  %v669_v4 = vpop.permute.xlu1 %668 }
  0xb6   : > { %1498 = vmatpush3.bf16.msra.mxu0 %v1708_v60  ;;  %1568 = vmatpush3.bf16.msra.mxu1 %v1709_v61  ;;  %v666_v5 = vpop.permute.xlu0 %665  ;;  %vm677_vm7 = vcmp.eq.s32.totalorder %v1945_v38, %v669_v4 }
  0xb7   : > { %1505 = vmatprep.mubr.msk.bf16.mxu0 %vm1955_vm5, %v1798_v43  ;;  %vm676_vm9 = vcmp.eq.s32.totalorder %v1945_v38, %v666_v5  ;;  %1499 = vmatprep.subr.bf16.mxu0 %v1710_v1 }
  0xb8   : > { %vm2045_vm10 = vmpackc.low %vm677_vm7, %vm676_vm9  ;;  %1569 = vmatprep.subr.bf16.mxu1 %v1711_v3 }
  0xb9   : > { %1558 = vmatmul.mubr.msk.bf16.gmra.mrb[4].mxu1 %vm2045_vm10, %v1798_v43 }
  0xba   : > { %1500 = vmatpush3.bf16.msra.mxu0 %v1710_v1  ;;  %1570 = vmatpush3.bf16.msra.mxu1 %v1711_v3 }
  0xbb   : > { %1577 = vmatprep.mubr.msk.bf16.mxu1 %vm1951_vm4, %v1798_v43  ;;  %1501 = vmatprep.subr.bf16.mxu0 %v1712_v6 }
  0xbc   : > { %1571 = vmatprep.subr.bf16.mxu1 %v1713_v8 }
  0xbe   : > { %1502 = vmatpush3.bf16.msra.mxu0 %v1712_v6  ;;  %1572 = vmatpush3.bf16.msra.mxu1 %v1713_v8 }
  0xbf   : > { %1503 = vmatprep.subr.bf16.mxu0 %v1714_v9  ;;  %1573 = vmatprep.subr.bf16.mxu1 %v1715_v10 }
  0xc2   : > { %1504 = vmatpush3.bf16.msra.mxu0 %v1714_v9  ;;  %1574 = vmatpush3.bf16.msra.mxu1 %v1715_v10 }
  0xc3   : > { %1513 = vmatprep.subr.bf16.mxu0 %v1716_v11  ;;  %1575 = vmatprep.subr.bf16.mxu1 %v1717_v12 }
  0xc5   : > { %1506 = vmatmul.mubr.msk.bf16.vlgmr.msra.gmra.mrb[0].mxu0 %vm1970_vm8, %v1798_v43 }
  0xc6   : > { %1509 = vmatprep.mubr.msk.bf16.mxu0 %vm2000_vm14, %v1798_v43  ;;  %1514 = vmatpush3.bf16.msra.mxu0 %v1716_v11 }
  0xc7   : > { %1576 = vmatpush3.bf16.msra.mxu1 %v1717_v12  ;;  %1515 = vmatprep.subr.bf16.mxu0 %v1718_v13 }
  0xc8   : > { %1585 = vmatprep.subr.bf16.mxu1 %v1719_v14 }
  0xca   : > { %1578 = vmatmul.mubr.msk.bf16.vlgmr.msra.gmra.mrb[0].mxu1 %vm1985_vm11, %v1798_v43  ;;  %1516 = vmatpush3.bf16.msra.mxu0 %v1718_v13 }
  0xcb   : > { %1581 = vmatprep.mubr.msk.bf16.mxu1 %vm2015_vm1, %v1798_v43  ;;  %1586 = vmatpush3.bf16.msra.mxu1 %v1719_v14 }
  0xcc   : > { %1517 = vmatprep.subr.bf16.mxu0 %v1720_v15  ;;  %1587 = vmatprep.subr.bf16.mxu1 %v1721_v16 }
  0xcd   : > { %1510 = vmatmul.mubr.msk.bf16.gmra.mrb[4].mxu0 %vm2027_vm6, %v1798_v43 }
  0xce   : > { %1518 = vmatpush3.bf16.msra.mxu0 %v1720_v15  ;;  %1529 = vmatprep.mubr.msk.bf16.mxu0 %vm1955_vm5, %v1798_v43 }
  0xcf   : > { %1588 = vmatpush3.bf16.msra.mxu1 %v1721_v16  ;;  %1519 = vmatprep.subr.bf16.mxu0 %v1722_v17 }
  0xd0   : > { %1589 = vmatprep.subr.bf16.mxu1 %v1723_v18 }
  0xd2   : > { %1582 = vmatmul.mubr.msk.bf16.gmra.mrb[4].mxu1 %vm2045_vm10, %v1798_v43  ;;  %1520 = vmatpush3.bf16.msra.mxu0 %v1722_v17 }
  0xd3   : > { %1590 = vmatpush3.bf16.msra.mxu1 %v1723_v18  ;;  %1601 = vmatprep.mubr.msk.bf16.mxu1 %vm1951_vm4, %v1798_v43 }
  0xd4   : > { %1521 = vmatprep.subr.bf16.mxu0 %v1724_v19  ;;  %1591 = vmatprep.subr.bf16.mxu1 %v1725_v20 }
  0xd6   : > { %1522 = vmatpush3.bf16.msra.mxu0 %v1724_v19 }
  0xd7   : > { %1592 = vmatpush3.bf16.msra.mxu1 %v1725_v20  ;;  %1523 = vmatprep.subr.bf16.mxu0 %v1726_v21 }
  0xd8   : > { %1593 = vmatprep.subr.bf16.mxu1 %v1727_v22 }
  0xda   : > { %1524 = vmatpush3.bf16.msra.mxu0 %v1726_v21 }
  0xdb   : > { %1594 = vmatpush3.bf16.msra.mxu1 %v1727_v22  ;;  %1525 = vmatprep.subr.bf16.mxu0 %v1728_v23 }
  0xdc   : > { %1595 = vmatprep.subr.bf16.mxu1 %v1729_v24 }
  0xde   : > { %1526 = vmatpush3.bf16.msra.mxu0 %v1728_v23 }
  0xdf   : > { %1596 = vmatpush3.bf16.msra.mxu1 %v1729_v24  ;;  %1527 = vmatprep.subr.bf16.mxu0 %v1730_v25 }
  0xe0   : > { %1597 = vmatprep.subr.bf16.mxu1 %v1731_v26 }
  0xe2   : > { %1528 = vmatpush3.bf16.msra.mxu0 %v1730_v25 }
  0xe3   : > { %1598 = vmatpush3.bf16.msra.mxu1 %v1731_v26 }
  0xe4   : > { %1599 = vmatprep.subr.bf16.mxu1 %v1732_v27 }
  0xe5   : > { %1530 = vmatmul.mubr.msk.bf16.vlgmr.msra.gmra.mrb[0].mxu0 %vm1970_vm8, %v1798_v43 }
  0xe6   : > { %1533 = vmatprep.mubr.msk.bf16.mxu0 %vm2000_vm14, %v1798_v43 }
  0xe7   : > { %1600 = vmatpush3.bf16.msra.mxu1 %v1732_v27 }
  0xea   : > { %1602 = vmatmul.mubr.msk.bf16.vlgmr.msra.gmra.mrb[0].mxu1 %vm1985_vm11, %v1798_v43 }
  0xeb   : > { %1605 = vmatprep.mubr.msk.bf16.mxu1 %vm2015_vm1, %v1798_v43 }
  0xed   : > { %1534 = vmatmul.mubr.msk.bf16.gmra.mrb[4].mxu0 %vm2027_vm6, %v1798_v43 }
  0xf2   : > { %1606 = vmatmul.mubr.msk.bf16.gmra.mrb[4].mxu1 %vm2045_vm10, %v1798_v43 }
 0x1b8   : > { %v1531_v28 = vpop.f32.mrb[0].mxu0 }
 0x1b9   : > { %631 = vst [vmem:[%s2160_s8 + $0x10] sm:$0xff] %v1531_v28  ;;  %v590_v29 = vpop.f32.mrb[1].mxu0 }
 0x1ba   : > { %629 = vst [vmem:[%s2160_s8] sm:$0xff] %v590_v29  ;;  %v1532_v30 = vpop.f32.mrb[2].mxu0 }
 0x1bb   : > { %632 = vst [vmem:[%s2160_s8 + $0x18] sm:$0xff] %v1532_v30  ;;  %v593_v31 = vpop.f32.mrb[3].mxu0 }
 0x1bc   : > { %630 = vst [vmem:[%s2160_s8 + $0x8] sm:$0xff] %v593_v31 }
 0x1bd   : > { %v1603_v32 = vpop.f32.mrb[0].mxu1 }
 0x1be   : > { %1377 = vst [vmem:[%s2160_s8 + $0x50] sm:$0xff] %v1603_v32  ;;  %v1054_v33 = vpop.f32.mrb[1].mxu1 }
 0x1bf   : > { %1375 = vst [vmem:[%s2160_s8 + $0x40] sm:$0xff] %v1054_v33  ;;  %v1604_v34 = vpop.f32.mrb[2].mxu1 }
 0x1c0   : > { %1378 = vst [vmem:[%s2160_s8 + $0x58] sm:$0xff] %v1604_v34  ;;  %v1057_v35 = vpop.f32.mrb[3].mxu1  ;;  %v1535_v36 = vpop.f32.mrb[4].mxu0 }
 0x1c1   : > { %1376 = vst [vmem:[%s2160_s8 + $0x48] sm:$0xff] %v1057_v35  ;;  %635 = vst [vmem:[%s2160_s8 + $0x30] sm:$0xff] %v1535_v36  ;;  %v606_v37 = vpop.f32.mrb[5].mxu0 }
 0x1c2   : > { %633 = vst [vmem:[%s2160_s8 + $0x20] sm:$0xff] %v606_v37  ;;  %v1536_v38 = vpop.f32.mrb[6].mxu0 }
 0x1c3   : > { %636 = vst [vmem:[%s2160_s8 + $0x38] sm:$0xff] %v1536_v38  ;;  %v609_v39 = vpop.f32.mrb[7].mxu0  ;;  %1109 = sbr.rel (!%p1855_p5) target bundleno = 486 (0x1e6), region = 32 }
 0x1c4   : > { %634 = vst [vmem:[%s2160_s8 + $0x28] sm:$0xff] %v609_v39 }
 0x1c5   : > { %v1607_v40 = vpop.f32.mrb[4].mxu1 }
 0x1c6   : > { %1381 = vst [vmem:[%s2160_s8 + $0x70] sm:$0xff] %v1607_v40  ;;  %v1070_v41 = vpop.f32.mrb[5].mxu1 }
 0x1c7   : > { %1379 = vst [vmem:[%s2160_s8 + $0x60] sm:$0xff] %v1070_v41  ;;  %v1608_v42 = vpop.f32.mrb[6].mxu1 }
 0x1c8   : > { %1382 = vst [vmem:[%s2160_s8 + $0x78] sm:$0xff] %v1608_v42  ;;  %v1073_v43 = vpop.f32.mrb[7].mxu1 }
 0x1c9   : > { %1380 = vst [vmem:[%s2160_s8 + $0x68] sm:$0xff] %v1073_v43 }
 0x1ca   : > { %s2267_s16 = smov (!%p1112_p11, %s1111_s16), 16 }
 0x1cb   : > { %s2185_s17 = sshll.u32 %s2267_s16, 7 }
 0x1cc   : > { %s1116_s22 = ssub.s32 2048, %s2185_s17 }
 0x1cd   : > { %1117 = vsyncadd %s2180_s14, %s1116_s22  ;;  %p1386_p12 = scmp.ne.s32.totalorder %s2185_s17, 0  ;;  %s1392_s23 = sshll.u32 %s1838_s13, 11 }
 0x1ce   : > { %s2194_s25 = scalar_lea.hbm %s2243_s2, %s1392_s23  ;;  %s1122_s21 = sshll.u32 %s2160_s8, 4  ;;  %s2197_s21 = int_to_ptr.vmem [resolvable:$true] %s1122_s21 }
 0x1cf   : > { %s1733_s26 = scalar_lea.vmem %s2197_s21, %s2185_s17  ;;  %s1799_s27 = smov [#allocation2]  }
 0x1d0   : > { %p1734_p13 = scmp.ne.s32.totalorder %s2197_s21, %s1733_s26  ;;  %s1737_s6 = sshll.u32 %s1799_s27, 4  ;;  %s1738_s6 = int_to_ptr.vmem [resolvable:$false] %s1737_s6 }
 0x1d1   : > { %s1739_s13 = scalar_lea.vmem %s1738_s6, 4096  ;;  %p1740_p2 = scmp.lt.s32.totalorder %s2197_s21, %s1738_s6 }
 0x1d2   : > { %p1735_p0 = pnand %p1734_p13, %p1386_p12  ;;  %p1741_p3 = scmp.lt.s32.totalorder %s1739_s13, %s1733_s26 }
 0x1d4   : > { %p1736_p1 = pneg %p1735_p0  ;;  %p1742_p4 = por %p1741_p3, %p1740_p2 }
 0x1d6   : > { %p1743_p5 = pnand %p1742_p4, %p1736_p1 }
 0x1d8   : > { %1746 = shalt.err (!%p1743_p5)
}
 0x1d9   : > { %s1747_s28 = scalar_lea.hbm %s2194_s25, %s2185_s17  ;;  %s1751_s3 = scalar_lea.hbm %s2243_s2, 4864 }
 0x1da   : > { %p1748_p7 = scmp.ne.s32.totalorder %s2194_s25, %s1747_s28  ;;  %p1752_p10 = scmp.lt.u32.totalorder %s2194_s25, %s2243_s2 }
 0x1db   : > { %p1753_p11 = scmp.lt.u32.totalorder %s1751_s3, %s1747_s28  ;;  %p1755_p0 = scmp.lt.u32.totalorder %s1747_s28, %s2194_s25 }
 0x1dc   : > { %p1749_p8 = pnand %p1748_p7, %p1386_p12 }
 0x1dd   : > { %p1754_p13 = por %p1753_p11, %p1752_p10 }
 0x1de   : > { %p1750_p9 = pneg %p1749_p8 }
 0x1df   : > { %p1756_p1 = por %p1755_p0, %p1754_p13 }
 0x1e1   : > { %p1757_p2 = pnand %p1756_p1, %p1750_p9 }
 0x1e3   : > { %1760 = shalt.err (!%p1757_p2)
}
 0x1e4   : > { %s1800_s7 = smov 128   ;;  %s1801_s8 = smov 8  }
 0x1e5   : > { %1128 = dma.vmem_to_hbm [thread:$0]  (%p1386_p12), %s2197_s21, %s2185_s17, %s2194_s25, %s2180_s14, %s1800_s7, %s1800_s7, %s1801_s8  }
 0x1e6 PF: > { %p1646_p3 = scmp.ge.s32.totalorder %s1795_s12, 2  ;;  %s1137_s16 = sand.u32 1, %s1783_s9  }
 0x1e7   : > { %s1138_s22 = scalar_lea.sflag [#allocation3], %s1137_s16 }
 0x1e8   : > { %p1643_p4 = pnand %p1646_p3, %p1859_p6 }
 0x1ea   : > { %1778 = dma.done.wait (!%p1643_p4), %s1138_s22, 2048  }
 0x1eb   : > { %1780 = vsyncadd (!%p1643_p4), %s1138_s22, 4294965248  ;;  %p12_p5 = scmp.ge.s32.totalorder %s1842_s15, 5   ;;  %s2262_s9 = smov %s1787_s10 }
 0x1ec   : > { %s2263_s10 = smov %s1791_s11  ;;  %s2264_s11 = smov %s1853_s18 }
 0x1ed   : > { %s2265_s12 = smov %s1842_s15  ;;  %14 = sbr.rel (!%p12_p5) target bundleno = 3 (0x3), region = 67 }
 0x1f4   :  { %1143 = vsyncpa [#allocation3], 1 }
 0x1f5   :  { %1145 = vsyncpa [#allocation3 + $0x1], 1 }

</bundles_post_ra>
